<compile_context>
chip_gen: v7x
topology: tpu7x:2x2x1
jax: 0.10.0
libtpu: 0.0.40
codegen_flags: <defaults>
</compile_context>

<pallas_src>
import jax
import jax.numpy as jnp
from jax.experimental import pallas as pl
from jax.experimental.pallas import tpu as pltpu

_LANES = 128                # lane-dense output -> unmasked vector stores
_SMALL_BATCH_ROWS = 512     # <= 64K elements: plain XLA broadcast is cheaper


def _stable_softplus(z):
    # Overflow-safe softplus; matches torch.nn.Softplus (beta=1, threshold=20)
    # to f32 precision.
    return jnp.maximum(z, 0.0) + jnp.log1p(jnp.exp(-jnp.abs(z)))


def _initial_wealth_kernel(params_ref, o_ref):
    # params_ref: SMEM (3,) = [weight, bias, scale]  (Linear(1,1) on all-ones x)
    w = params_ref[0]
    b = params_ref[1]
    scale = params_ref[2]
    val = scale * _stable_softplus(w + b)
    # Pure broadcast store: the kernel is HBM-store-bound only.
    o_ref[...] = jnp.full(o_ref.shape, val, dtype=o_ref.dtype)


def _round_up(x: int, m: int) -> int:
    return ((x + m - 1) // m) * m


def _tile_budget():
    """Return (max_tile_rows, vmem_limit_bytes) for the current TPU generation."""
    kind = ""
    try:
        kind = jax.devices()[0].device_kind.lower()
    except Exception:
        pass
    if "v7" in kind:
        # v7x: ~3.2 TB/s HBM per TC but only 64 MiB physical VMEM (32 MiB scoped
        # default).  16 MiB tile (32 MiB double-buffered) amortizes the fixed
        # per-step overhead; raise the scoped VMEM limit explicitly.
        return 32768, 48 * 1024 * 1024
    # v5e / v6e: 4 MiB tile (8 MiB double-buffered) is ~90% of the v5e store
    # roofline and fits v5e's 16 MiB scoped-VMEM default without overrides.
    return 8192, None


def initial_wealth_net(batch_size: int,
                       weight: jax.Array,
                       bias: jax.Array,
                       scale: float = 1.0,
                       *,
                       force_pallas: bool = False) -> jax.Array:
    """Equivalent of InitialWealthNet.forward(batch_size) -> (batch_size, 1) f32."""
    w = weight.reshape(()).astype(jnp.float32)
    b = bias.reshape(()).astype(jnp.float32)
    s = jnp.asarray(scale, jnp.float32)

    rows_total = max(1, pl.cdiv(batch_size, _LANES))

    # Small batches: the fixed pallas_call dispatch (~1-2 us) dominates; a plain
    # XLA broadcast hits the same HBM store roofline with no custom-call cost.
    if rows_total <= _SMALL_BATCH_ROWS and not force_pallas:
        val = s * _stable_softplus(w + b)
        return jnp.full((batch_size, 1), val, dtype=jnp.float32)

    params = jnp.stack([w, b, s])  # (3,) f32, resident in SMEM

    max_tile_rows, vmem_limit = _tile_budget()
    if rows_total > max_tile_rows:
        tile_rows = max_tile_rows                       # grid >= 2 automatically
    elif rows_total >= 16:
        # Force >=2 grid steps so the "parallel" grid shards across both of
        # v7x's TensorCores (harmless on single-TC v5e/v6e).
        tile_rows = _round_up(pl.cdiv(rows_total, 2), 8)
    else:
        tile_rows = rows_total                          # single block == full array
    grid = (pl.cdiv(rows_total, tile_rows),)

    padded = pl.pallas_call(
        _initial_wealth_kernel,
        out_shape=jax.ShapeDtypeStruct((rows_total, _LANES), jnp.float32),
        grid=grid,
        in_specs=[
            # Tiny whole-array scalar operand; copied to SMEM once for the grid.
            pl.BlockSpec(memory_space=pltpu.MemorySpace.SMEM),
        ],
        out_specs=pl.BlockSpec((tile_rows, _LANES), lambda i: (i, 0)),
        compiler_params=pltpu.CompilerParams(
            dimension_semantics=("parallel",),
            vmem_limit_bytes=vmem_limit,
        ),
        cost_estimate=pl.CostEstimate(
            flops=0,
            transcendentals=2,
            bytes_accessed=rows_total * _LANES * 4,
        ),
    )(params)

    # Back to the module's logical (batch_size, 1) layout.
    if batch_size % _LANES == 0:
        # Layout-compatible reshape: no extra HBM copy.
        return padded.reshape(batch_size, 1)
    # TODO(synk): for ragged batch sizes this trim re-materializes the output in
    # HBM; callers that can consume the 128-padded slab should do so directly.
    return padded.reshape(-1)[:batch_size].reshape(batch_size, 1)


if __name__ == "__main__":
    key = jax.random.PRNGKey(0)

    # Module-default parameters: weight = 1.0 (uniform_[1, 1]), bias = 0.0.
    weight = jnp.ones((1, 1), dtype=jnp.float32)
    bias = jnp.zeros((1,), dtype=jnp.float32)

    def ref(batch, w, b, scale=1.0):
        val = scale * jax.nn.softplus(w.reshape(()) + b.reshape(()))
        return jnp.full((batch, 1), val, dtype=jnp.float32)

    # 1) Small batch through the Pallas kernel (single block).
    out = jax.block_until_ready(initial_wealth_net(8, weight, bias, force_pallas=True))
    assert out.shape == (8, 1) and out.dtype == jnp.float32, (out.shape, out.dtype)
    assert jnp.allclose(out, ref(8, weight, bias), atol=1e-6)

    # 2) Ragged batch (not a multiple of 128): kernel + wrapper trim path.
    out = jax.block_until_ready(initial_wealth_net(300, weight, bias, force_pallas=True))
    assert out.shape == (300, 1), out.shape
    assert jnp.allclose(out, ref(300, weight, bias), atol=1e-6)

    # 3) 128-aligned batch exercising the >=2-step "parallel" grid and the
    #    copy-free reshape, with params drawn from PRNGKey(0).
    wk, bk = jax.random.split(key)
    w_rand = jax.random.normal(wk, (1, 1), dtype=jnp.float32)
    b_rand = jax.random.normal(bk, (1,), dtype=jnp.float32)
    out = jax.block_until_ready(initial_wealth_net(2048, w_rand, b_rand, force_pallas=True))
    assert out.shape == (2048, 1), out.shape
    assert jnp.allclose(out, ref(2048, w_rand, b_rand), atol=1e-6)

    # 4) Default dispatch path for small batches (plain XLA broadcast bypass).
    out = jax.block_until_ready(initial_wealth_net(8, weight, bias))
    assert jnp.allclose(out, ref(8, weight, bias), atol=1e-6)

    print("KERNEL_OK")
</pallas_src>

<mosaic_0001>
module attributes {stable_mosaic.version = 11 : i64} {
  func.func @_initial_wealth_kernel(%arg0: i32, %arg1: memref<3xf32, #tpu.memory_space<smem>>, %arg2: memref<1x128xf32, #tpu.memory_space<vmem>>) attributes {dimension_semantics = [#tpu.dimension_semantics<parallel>], iteration_bounds = array<i64: 1>, scalar_prefetch = 0 : i64, scratch_operands = 0 : i64, tpu.core_type = #tpu.core_type<tc>, window_params = [{transform_indices = @transform_0, window_bounds = array<i64: 3>}, {transform_indices = @transform_1, window_bounds = array<i64: 1, 128>}]} {
    %c0 = arith.constant 0 : index
    %0 = memref.load %arg1[%c0] : memref<3xf32, #tpu.memory_space<smem>>
    %c1 = arith.constant 1 : index
    %1 = memref.load %arg1[%c1] : memref<3xf32, #tpu.memory_space<smem>>
    %c2 = arith.constant 2 : index
    %2 = memref.load %arg1[%c2] : memref<3xf32, #tpu.memory_space<smem>>
    %3 = arith.addf %0, %1 : f32
    %cst = arith.constant 0.000000e+00 : f32
    %4 = arith.maximumf %3, %cst : f32
    %5 = math.absf %3 : f32
    %cst_0 = arith.constant 0.000000e+00 : f32
    %6 = arith.subf %cst_0, %5 : f32
    %7 = math.exp %6 : f32
    %8 = math.log1p %7 : f32
    %9 = arith.addf %4, %8 : f32
    %10 = arith.mulf %2, %9 : f32
    %11 = vector.broadcast %10 : f32 to vector<1x128xf32>
    %c0_1 = arith.constant 0 : index
    %c0_2 = arith.constant 0 : index
    %12 = vector.load %arg2[%c0_1, %c0_2] : memref<1x128xf32, #tpu.memory_space<vmem>>, vector<1x128xf32>
    tpu.vector_store %arg2[%c0_1, %c0_2], %11 {strides = array<i32>} : memref<1x128xf32, #tpu.memory_space<vmem>>, vector<1x128xf32>,
    return
  }
  func.func @transform_0(%arg0: i32) -> i32 {
    %c0_i32 = arith.constant 0 : i32
    %c0_i32_0 = arith.constant 0 : i32
    return %c0_i32 : i32
  }
  func.func @transform_1(%arg0: i32) -> (i32, i32) {
    %c0_i32 = arith.constant 0 : i32
    %c0_i32_0 = arith.constant 0 : i32
    return %arg0, %c0_i32 : i32, i32
  }
}

</mosaic_0001>

<bundles_post_ra>
// kernel: tpu_custom_call.1
= control target key start
LH: loop header
LB: loop body
LE: loop exit
PB: predicated region body
PF: predicated region fallthrough
CT: control target
= control target key end

     0   :  { %6 = vsyncpa [#allocation4], 0  ;;  %s147_s0 = inlined_call_operand.hbm [shape: f32[3], index: 0, kind: input, shape index: {}]   ;;  %s148_s1 = inlined_call_operand.hbm [shape: f32[1,128], index: 1, kind: output, shape index: {}]  }
   0x1   :  { %7 = vsyncpa [#allocation3], 0  ;;  %s74_s8 = scalar_lea.hbm %s147_s0, 16 }
   0x2   :  { %p75_p0 = scmp.ne.s32.totalorder %s147_s0, %s74_s8  ;;  %p78_p1 = scmp.lt.u32.totalorder %s74_s8, %s147_s0 }
   0x4   :  { %p80_p2 = pnand %p78_p1, %p75_p0 }
   0x6   :  { %83 = shalt.err (!%p80_p2)
}
   0x7   :  { %s110_s13 = smov [#allocation2]  }
   0x8   :  { %15 = dma.hbm_to_smem %s147_s0, 16, %s110_s13, [#allocation4]  }
   0x9   :  { %106 = dma.done.wait [#allocation4], 16  }
   0xa   :  { %107 = vsyncadd [#allocation4], 4294967280 }
   0xb   :  { %19 = sfence }
   0xc   :  { %s20_s16 = sld [smem:[#allocation2]]  ;;  %s61_s17 = sld [smem:[#allocation2 + $0x1]] }
   0xd   :  { %s62_s0 = sld [smem:[#allocation2 + $0x2]]  ;;  %s111_s22 = smov 0.0  }
   0xe   :  { %s112_s26 = smov [#allocation5]  }
   0xf   :  { %s52_s27 = sshll.u32 %s112_s26, 4  ;;  %s53_s27 = int_to_ptr.vmem [resolvable:$true] %s52_s27 }
  0x10   :  { %s84_s29 = scalar_lea.vmem %s53_s27, 16  ;;  %s88_s30 = scalar_lea.vmem %s53_s27, 32 }
  0x11   :  { %p85_p3 = scmp.ne.s32.totalorder %s53_s27, %s84_s29  ;;  %p89_p4 = scmp.lt.s32.totalorder %s53_s27, %s53_s27 }
  0x12   :  { %s23_s18 = sadd.f32 %s61_s17, %s20_s16  ;;  %p90_p5 = scmp.lt.s32.totalorder %s88_s30, %s84_s29 }
  0x14   :  { %s25_s19 = sand.u32 2147483647, %s23_s18  ;;  %s24_s23 = smax.f32 %s111_s22, %s23_s18 }
  0x15   :  { %s26_s20 = ssub.f32 0.0, %s25_s19  ;;  %p91_p6 = por %p90_p5, %p89_p4 }
  0x17   :  { %v27_v0 = vstv %s26_s20  ;;  %p92_p7 = pnand %p91_p6, %p85_p3 }
  0x18   :  { %v28_v1 = vmul.f32 1.442695, %v27_v0 }
  0x1a   :  { %70 = vpow2.f32 %v28_v1 }
  0x24   :  { %v71_v2 = vpop.eup %70 }
  0x25   :  { %63 = vpush %v71_v2 }
  0x56   :  { %s64_s21 = spop %63 }
  0x57   :  { %v31_v3 = vstv %s64_s21 }
  0x58   :  { %v32_v4 = vadd.f32 1.0, %v31_v3  ;;  %v35_v5 = vmul.f32 -0.5, %v31_v3  ;;  %v38_v7 = vand.u32 2147483647, %v31_v3 }
  0x5a   :  { %72 = vlog2.f32 %v32_v4  ;;  %v36_v6 = vadd.f32 1.0, %v35_v5  ;;  %vm39_vm0 = vcmp.lt.f32.partialorder %v38_v7, 0.0004427343 }
  0x5c   :  { %v37_v9 = vmul.f32 %v36_v6, %v31_v3 }
  0x64   :  { %v73_v8 = vpop.eup %72 }
  0x65   :  { %v34_v10 = vmul.f32 0.6931472, %v73_v8 }
  0x67   :  { %v40_v11 = vsel %vm39_vm0, %v37_v9, %v34_v10 }
  0x68   :  { %65 = vpush %v40_v11 }
  0x99   :  { %s66_s24 = spop %65 }
  0x9a   :  { %s42_s25 = sadd.f32 %s66_s24, %s24_s23 }
  0x9c   :  { %s43_s28 = smul.f32 %s62_s0, %s42_s25 }
  0x9e   :  { %v44_v12 = vstv %s43_s28 }
  0x9f   :  { %45 = vst [vmem:[#allocation5] sm:$0x1] %v44_v12 }
  0xa0   :  { %95 = shalt.err (!%p92_p7)
}
  0xa1   :  { %s96_s4 = scalar_lea.hbm %s148_s1, 16 }
  0xa2   :  { %p97_p8 = scmp.ne.s32.totalorder %s148_s1, %s96_s4  ;;  %p100_p9 = scmp.lt.u32.totalorder %s96_s4, %s148_s1 }
  0xa4   :  { %p102_p10 = pnand %p100_p9, %p97_p8 }
  0xa6   :  { %105 = shalt.err (!%p102_p10)
}
  0xa7   :  { %55 = dma.vmem_to_hbm [thread:$0]  %s53_s27, 16, %s148_s1, [#allocation3]  }
  0xa8   :  { %108 = dma.done.wait [#allocation3], 16  }
  0xa9   :  { %109 = vsyncadd [#allocation3], 4294967280 }
  0xaa   :  { %59 = vsyncpa [#allocation3], 1 }
  0xab   :  { %60 = vsyncpa [#allocation4], 1 }

</bundles_post_ra>
